<compile_context>
chip_gen: v5e
topology: v5e:2x2
jax: 0.10.0
libtpu: 0.0.40
codegen_flags: <defaults>
</compile_context>

<pallas_src>
import jax
import jax.numpy as jnp
from jax.experimental import pallas as pl
from jax.experimental.pallas import tpu as pltpu


# ----------------------------------------------------------------------------
# Kernel: fused  tanh(x @ W1 + b1) @ W2 + b2  on a tile of packed pixel rows
# ----------------------------------------------------------------------------
def _mlp_kernel(x_ref, w1_ref, b1_ref, w2_ref, b2_ref, o_ref):
    # x_ref: (tm, P*c_in); w1: (P*c_in, P*c_hid) block-diag; b1: (1, P*c_hid)
    # w2: (P*c_hid, P*c_out) block-diag; b2: (1, P*c_out); o_ref: (tm, P*c_out)
    x = x_ref[...]
    h = jnp.tanh(
        jnp.dot(x, w1_ref[...], preferred_element_type=jnp.float32)
        + b1_ref[...].astype(jnp.float32)
    )
    out = (
        jnp.dot(h, w2_ref[...].astype(jnp.float32),
                preferred_element_type=jnp.float32)
        + b2_ref[...].astype(jnp.float32)
    )
    o_ref[...] = out.astype(o_ref.dtype)


# ----------------------------------------------------------------------------
# Parameter init (mirrors nn.Conv2d(c, c', 1) default init; deterministic)
# ----------------------------------------------------------------------------
def init_mlp_params(key, c_in, c_out, dtype=jnp.float32):
    c_hid = c_in // 2
    k1w, k1b, k2w, k2b = jax.random.split(key, 4)

    def conv1x1(kw, kb, ci, co):
        bound = 1.0 / float(ci) ** 0.5          # PyTorch fan_in bound
        # PyTorch weight is (co, ci, 1, 1); store transposed (ci, co) for matmul.
        w = jax.random.uniform(kw, (ci, co), dtype, minval=-bound, maxval=bound)
        b = jax.random.uniform(kb, (1, co), dtype, minval=-bound, maxval=bound)
        return w, b

    w1, b1 = conv1x1(k1w, k1b, c_in, c_hid)
    w2, b2 = conv1x1(k2w, k2b, c_hid, c_out)
    return w1, b1, w2, b2


# ----------------------------------------------------------------------------
# Forward wrapper
# ----------------------------------------------------------------------------
def _round_up(a, b):
    return ((a + b - 1) // b) * b


def _pick_pack(m):
    # Largest of 16/8/4/2/1 that divides M so the packing reshape stays free.
    # (Odd M falls back to P=1 — still correct, just lane-sparse.)
    for p in (16, 8, 4, 2):
        if m % p == 0:
            return p
    return 1


def mlp_forward(x, params, tile_pixels=65536):
    """x: (N, H, W, c_in) NHWC.  Returns (N, H, W, c_out)."""
    w1, b1, w2, b2 = params
    N, H, W, c_in = x.shape
    c_hid = w1.shape[1]
    c_out = w2.shape[1]
    M = N * H * W

    # ---- lane packing: P pixels share one row; block-diagonal weights ----
    P = _pick_pack(M)
    rows = M // P
    w1_blk = jnp.kron(jnp.eye(P, dtype=w1.dtype), w1)   # (P*c_in,  P*c_hid)
    w2_blk = jnp.kron(jnp.eye(P, dtype=w2.dtype), w2)   # (P*c_hid, P*c_out)
    b1_blk = jnp.tile(b1, (1, P))                        # (1, P*c_hid)
    b2_blk = jnp.tile(b2, (1, P))                        # (1, P*c_out)
    x2d = x.reshape(rows, P * c_in)                      # free reshape (contiguous)

    # ---- tile size: big tiles amortize per-step overhead; if everything fits
    # in one tile but is still sizeable, split in two so v7x's two TensorCores
    # both get work on the "parallel" axis ----
    tm_cap = max(8, (tile_pixels // P) // 8 * 8)
    if rows <= tm_cap:
        tm = _round_up(pl.cdiv(rows, 2), 8) if rows >= 1024 else rows
    else:
        tm = min(tm_cap, _round_up(pl.cdiv(rows, 2), 8))
    grid = (pl.cdiv(rows, tm),)                          # ragged tail masked

    # ---- explicit VMEM budget: double-buffered in/out blocks + resident W ----
    x_item = jnp.dtype(x.dtype).itemsize
    w_item = jnp.dtype(w1.dtype).itemsize
    in_blk_bytes = tm * P * c_in * x_item
    out_blk_bytes = tm * P * c_out * x_item
    w_bytes = (P * c_in * P * c_hid + P * c_hid * P * c_out
               + P * c_hid + P * c_out) * w_item
    vmem_limit = int(2 * (in_blk_bytes + out_blk_bytes) + 2 * w_bytes + (4 << 20))

    cost = pl.CostEstimate(
        flops=2 * rows * (P * c_in * P * c_hid + P * c_hid * P * c_out),
        transcendentals=M * c_hid,
        bytes_accessed=x_item * M * (c_in + c_out) + w_bytes,
    )

    out2d = pl.pallas_call(
        _mlp_kernel,
        out_shape=jax.ShapeDtypeStruct((rows, P * c_out), x.dtype),
        grid=grid,
        in_specs=[
            pl.BlockSpec((tm, P * c_in), lambda i: (i, 0)),
            pl.BlockSpec((P * c_in, P * c_hid), lambda i: (0, 0)),   # resident
            pl.BlockSpec((1, P * c_hid), lambda i: (0, 0)),
            pl.BlockSpec((P * c_hid, P * c_out), lambda i: (0, 0)),
            pl.BlockSpec((1, P * c_out), lambda i: (0, 0)),
        ],
        out_specs=pl.BlockSpec((tm, P * c_out), lambda i: (i, 0)),
        compiler_params=pltpu.CompilerParams(
            dimension_semantics=("parallel",),
            vmem_limit_bytes=vmem_limit,
        ),
        cost_estimate=cost,
    )(x2d, w1_blk, b1_blk, w2_blk, b2_blk)

    return out2d.reshape(N, H, W, c_out)


# ----------------------------------------------------------------------------
# Test
# ----------------------------------------------------------------------------
if __name__ == "__main__":
    key = jax.random.PRNGKey(0)
    kx, kp, kx2, kx3 = jax.random.split(key, 4)

    # Shapes implied by the module: NHWC input, hidden = c_in // 2.
    N, H, W, c_in, c_out = 2, 16, 16, 32, 8
    params = init_mlp_params(kp, c_in, c_out)
    w1, b1, w2, b2 = params

    def ref_fwd(xx):
        h = jnp.tanh(jnp.einsum("nhwc,cd->nhwd", xx, w1) + b1[0])
        return jnp.einsum("nhwd,do->nhwo", h, w2) + b2[0]

    # --- case 1: small, single tile (M = 512, P = 16, rows = 32) ---
    x = jax.random.normal(kx, (N, H, W, c_in), jnp.float32)
    out = jax.block_until_ready(mlp_forward(x, params))
    assert out.shape == (N, H, W, c_out)
    assert jnp.allclose(out, ref_fwd(x), atol=2e-5, rtol=2e-5)

    # --- case 2: non-power-of-two pixel count (M = 3*20*20 = 1200, rows = 75) ---
    x2 = jax.random.normal(kx2, (3, 20, 20, c_in), jnp.float32)
    out2 = jax.block_until_ready(mlp_forward(x2, params))
    assert out2.shape == (3, 20, 20, c_out)
    assert jnp.allclose(out2, ref_fwd(x2), atol=2e-5, rtol=2e-5)

    # --- case 3: multi-tile path with the 2-way megacore split + ragged mask
    #     (M = 4*64*64 = 16384, rows = 1024, tm = 512, grid = 2) ---
    x3 = jax.random.normal(kx3, (4, 64, 64, c_in), jnp.float32)
    out3 = jax.block_until_ready(mlp_forward(x3, params))
    assert out3.shape == (4, 64, 64, c_out)
    assert jnp.allclose(out3, ref_fwd(x3), atol=2e-5, rtol=2e-5)

    print("KERNEL_OK")
</pallas_src>

<mosaic_0001>
module attributes {stable_mosaic.version = 11 : i64} {
  func.func @_mlp_kernel(%arg0: i32, %arg1: memref<32x512xf32, #tpu.memory_space<vmem>>, %arg2: memref<512x256xf32, #tpu.memory_space<vmem>>, %arg3: memref<1x256xf32, #tpu.memory_space<vmem>>, %arg4: memref<256x128xf32, #tpu.memory_space<vmem>>, %arg5: memref<1x128xf32, #tpu.memory_space<vmem>>, %arg6: memref<32x128xf32, #tpu.memory_space<vmem>>) attributes {dimension_semantics = [#tpu.dimension_semantics<parallel>], iteration_bounds = array<i64: 1>, scalar_prefetch = 0 : i64, scratch_operands = 0 : i64, tpu.core_type = #tpu.core_type<tc>, window_params = [{transform_indices = @transform_0, window_bounds = array<i64: 32, 512>}, {pipeline_mode = #tpu.pipeline_mode<synchronous>, transform_indices = @transform_1, window_bounds = array<i64: 512, 256>}, {pipeline_mode = #tpu.pipeline_mode<synchronous>, transform_indices = @transform_2, window_bounds = array<i64: 1, 256>}, {pipeline_mode = #tpu.pipeline_mode<synchronous>, transform_indices = @transform_3, window_bounds = array<i64: 256, 128>}, {pipeline_mode = #tpu.pipeline_mode<synchronous>, transform_indices = @transform_4, window_bounds = array<i64: 1, 128>}, {transform_indices = @transform_5, window_bounds = array<i64: 32, 128>}]} {
    %c0 = arith.constant 0 : index
    %c0_0 = arith.constant 0 : index
    %0 = vector.load %arg1[%c0, %c0_0] : memref<32x512xf32, #tpu.memory_space<vmem>>, vector<32x512xf32>
    %c0_1 = arith.constant 0 : index
    %c0_2 = arith.constant 0 : index
    %1 = vector.load %arg2[%c0_1, %c0_2] : memref<512x256xf32, #tpu.memory_space<vmem>>, vector<512x256xf32>
    %cst = arith.constant dense<0.000000e+00> : vector<32x256xf32>
    %2 = tpu.matmul %0, %1, %cst {dimension_numbers = #tpu.dot_dimension_numbers<[1], [0], [0], [1], [0, 0, 1, 1], [], []>} : vector<32x512xf32>, vector<512x256xf32>, vector<32x256xf32> -> vector<32x256xf32>
    %c0_3 = arith.constant 0 : index
    %c0_4 = arith.constant 0 : index
    %3 = vector.load %arg3[%c0_3, %c0_4] : memref<1x256xf32, #tpu.memory_space<vmem>>, vector<1x256xf32>
    %4 = vector.broadcast %3 : vector<1x256xf32> to vector<32x256xf32>
    %5 = arith.addf %2, %4 : vector<32x256xf32>
    %6 = math.tanh %5 : vector<32x256xf32>
    %c0_5 = arith.constant 0 : index
    %c0_6 = arith.constant 0 : index
    %7 = vector.load %arg4[%c0_5, %c0_6] : memref<256x128xf32, #tpu.memory_space<vmem>>, vector<256x128xf32>
    %cst_7 = arith.constant dense<0.000000e+00> : vector<32x128xf32>
    %8 = tpu.matmul %6, %7, %cst_7 {dimension_numbers = #tpu.dot_dimension_numbers<[1], [0], [0], [1], [0, 0, 1, 1], [], []>} : vector<32x256xf32>, vector<256x128xf32>, vector<32x128xf32> -> vector<32x128xf32>
    %c0_8 = arith.constant 0 : index
    %c0_9 = arith.constant 0 : index
    %9 = vector.load %arg5[%c0_8, %c0_9] : memref<1x128xf32, #tpu.memory_space<vmem>>, vector<1x128xf32>
    %10 = vector.broadcast %9 : vector<1x128xf32> to vector<32x128xf32>
    %11 = arith.addf %8, %10 : vector<32x128xf32>
    %c0_10 = arith.constant 0 : index
    %c0_11 = arith.constant 0 : index
    %12 = vector.load %arg6[%c0_10, %c0_11] : memref<32x128xf32, #tpu.memory_space<vmem>>, vector<32x128xf32>
    tpu.vector_store %arg6[%c0_10, %c0_11], %11 {strides = array<i32>} : memref<32x128xf32, #tpu.memory_space<vmem>>, vector<32x128xf32>,
    return
  }
  func.func @transform_0(%arg0: i32) -> (i32, i32) {
    %c0_i32 = arith.constant 0 : i32
    %c0_i32_0 = arith.constant 0 : i32
    return %arg0, %c0_i32 : i32, i32
  }
  func.func @transform_1(%arg0: i32) -> (i32, i32) {
    %c0_i32 = arith.constant 0 : i32
    %c0_i32_0 = arith.constant 0 : i32
    %c0_i32_1 = arith.constant 0 : i32
    return %c0_i32, %c0_i32_0 : i32, i32
  }
  func.func @transform_2(%arg0: i32) -> (i32, i32) {
    %c0_i32 = arith.constant 0 : i32
    %c0_i32_0 = arith.constant 0 : i32
    %c0_i32_1 = arith.constant 0 : i32
    return %c0_i32, %c0_i32_0 : i32, i32
  }
  func.func @transform_3(%arg0: i32) -> (i32, i32) {
    %c0_i32 = arith.constant 0 : i32
    %c0_i32_0 = arith.constant 0 : i32
    %c0_i32_1 = arith.constant 0 : i32
    return %c0_i32, %c0_i32_0 : i32, i32
  }
  func.func @transform_4(%arg0: i32) -> (i32, i32) {
    %c0_i32 = arith.constant 0 : i32
    %c0_i32_0 = arith.constant 0 : i32
    %c0_i32_1 = arith.constant 0 : i32
    return %c0_i32, %c0_i32_0 : i32, i32
  }
  func.func @transform_5(%arg0: i32) -> (i32, i32) {
    %c0_i32 = arith.constant 0 : i32
    %c0_i32_0 = arith.constant 0 : i32
    return %arg0, %c0_i32 : i32, i32
  }
}

</mosaic_0001>

<bundles_post_ra>
// kernel: tpu_custom_call.1
= control target key start
LH: loop header
LB: loop body
LE: loop exit
PB: predicated region body
PF: predicated region fallthrough
CT: control target
= control target key end

     0   :  { %10 = vsyncpa [#allocation3], 0  ;;  %s918_s0 = inlined_call_operand.hbm [shape: f32[32,512], index: 0, kind: input, shape index: {}]   ;;  %s919_s1 = inlined_call_operand.hbm [shape: f32[512,256], index: 1, kind: input, shape index: {}]   ;;  %s920_s2 = inlined_call_operand.hbm [shape: f32[1,256], index: 2, kind: input, shape index: {}]   ;;  %s921_s3 = inlined_call_operand.hbm [shape: f32[256,128], index: 3, kind: input, shape index: {}]   ;;  %s922_s4 = inlined_call_operand.vmem [shape: f32[1,128], index: 4, kind: input, shape index: {}]   ;;  %s923_s5 = inlined_call_operand.hbm [shape: f32[32,128], index: 5, kind: output, shape index: {}]  }
   0x1   :  { %11 = vsyncpa [#allocation6], 0 }
   0x2   :  { %12 = vsyncpa [#allocation9], 0  ;;  %s31_s20 = sshll.u32 %s919_s1, 4  ;;  %s32_s20 = int_to_ptr.hbm [resolvable:$true] %s31_s20 }
   0x3   :  { %13 = vsyncpa [#allocation4], 0  ;;  %s779_s21 = smov [#allocation5]   ;;  %s18_s25 = sshll.u32 %s918_s0, 4  ;;  %s19_s25 = int_to_ptr.hbm [resolvable:$true] %s18_s25 }
   0x4   :  { %s33_s22 = sshll.u32 %s779_s21, 4  ;;  %s780_s26 = smov 256   ;;  %s34_s22 = int_to_ptr.vmem [resolvable:$true] %s33_s22 }
   0x5   :  { %s781_s27 = smov 16   ;;  %s782_s28 = smov [#allocation2]  }
   0x6   :  { %39 = dma.hbm_to_vmem [thread:$0]  %s32_s20, 16384, %s34_s22, [#allocation6], %s780_s26, %s780_s26, %s781_s27  }
   0x7   :  { %s20_s29 = sshll.u32 %s782_s28, 4  ;;  %s783_s30 = smov 512   ;;  %s21_s29 = int_to_ptr.vmem [resolvable:$true] %s20_s29 }
   0x8   :  { %s784_s6 = smov 32   ;;  %s45_s8 = sshll.u32 %s920_s2, 4  ;;  %s46_s8 = int_to_ptr.hbm [resolvable:$true] %s45_s8 }
   0x9   :  { %26 = dma.hbm_to_vmem [thread:$0]  %s19_s25, 2048, %s21_s29, [#allocation3], %s783_s30, %s783_s30, %s784_s6  }
   0xa   :  { %s785_s9 = smov [#allocation7]   ;;  %s55_s12 = sshll.u32 %s921_s3, 4  ;;  %s56_s12 = int_to_ptr.hbm [resolvable:$true] %s55_s12 }
   0xb   :  { %s47_s10 = sshll.u32 %s785_s9, 4  ;;  %s786_s13 = smov [#allocation8]   ;;  %s48_s10 = int_to_ptr.vmem [resolvable:$true] %s47_s10 }
   0xc   :  { %50 = dma.hbm_to_vmem [thread:$0]  %s46_s8, 32, %s48_s10, [#allocation6]  }
   0xd   :  { %s57_s14 = sshll.u32 %s786_s13, 4  ;;  %s787_s15 = smov 128   ;;  %s58_s14 = int_to_ptr.vmem [resolvable:$true] %s57_s14 }
   0xe   :  { %s788_s16 = smov 8  }
   0xf   :  { %63 = dma.hbm_to_vmem [thread:$0]  %s56_s12, 4096, %s58_s14, [#allocation9], %s787_s15, %s787_s15, %s788_s16  }
  0x10   :  { %771 = dma.done.wait [#allocation3], 2048  }
  0x11   :  { %772 = vsyncadd [#allocation3], 4294965248 }
  0x12   :  { %773 = dma.done.wait [#allocation6], 16416  }
  0x13   :  { %774 = vsyncadd [#allocation6], 4294950880 }
  0x14   :  { %775 = dma.done.wait [#allocation9], 4096  }
  0x15   :  { %776 = vsyncadd [#allocation9], 4294963200  ;;  %v192_v0 = vld [vmem:[#allocation5 + $0x2f0] sm:$0xff]  ;;  %v190_v2 = vld [vmem:[#allocation5 + $0x2e0] sm:$0xff]  ;;  %s789_s17 = smov [#allocation10]  }
  0x16   :  { %v128_v1 = vld [vmem:[#allocation5 + $0xf0] sm:$0xff]  ;;  %290 = vmatpush.msra.mxu2 %v192_v0  ;;  %v126_v4 = vld [vmem:[#allocation5 + $0xe0] sm:$0xff]  ;;  %v193_v0 = vld [vmem:[#allocation5 + $0x2f8] sm:$0xff]  ;;  %s574_s18 = sshll.u32 %s789_s17, 4  ;;  %s575_s18 = int_to_ptr.vmem [resolvable:$true] %s574_s18 }
  0x17   :  { %232 = vmatpush.msra.mxu0 %v128_v1  ;;  %v224_v3 = vld [vmem:[#allocation5 + $0x3f0] sm:$0xff]  ;;  %v222_v7 = vld [vmem:[#allocation5 + $0x3e0] sm:$0xff] }
  0x18   :  { %v160_v5 = vld [vmem:[#allocation5 + $0x1f0] sm:$0xff]  ;;  %319 = vmatpush.msra.mxu3 %v224_v3  ;;  %291 = vmatpush.msra.mxu2 %v190_v2  ;;  %v158_v9 = vld [vmem:[#allocation5 + $0x1e0] sm:$0xff]  ;;  %v839_v2 = vld [vmem:[#allocation2 + $0x18] sm:$0xff] }
  0x19   :  { %261 = vmatpush.msra.mxu1 %v160_v5  ;;  %v188_v6 = vld [vmem:[#allocation5 + $0x2d0] sm:$0xff]  ;;  %233 = vmatpush.msra.mxu0 %v126_v4  ;;  %v186_v11 = vld [vmem:[#allocation5 + $0x2c0] sm:$0xff]  ;;  %v129_v3 = vld [vmem:[#allocation5 + $0xf8] sm:$0xff] }
  0x1a   :  { %v124_v8 = vld [vmem:[#allocation5 + $0xd0] sm:$0xff]  ;;  %320 = vmatpush.msra.mxu3 %v222_v7  ;;  %v122_v12 = vld [vmem:[#allocation5 + $0xc0] sm:$0xff]  ;;  %292 = vmatpush.msra.mxu2 %v188_v6  ;;  %v191_v4 = vld [vmem:[#allocation5 + $0x2e8] sm:$0xff] }
  0x1b   :  { %v220_v10 = vld [vmem:[#allocation5 + $0x3d0] sm:$0xff]  ;;  %262 = vmatpush.msra.mxu1 %v158_v9  ;;  %234 = vmatpush.msra.mxu0 %v124_v8  ;;  %v218_v14 = vld [vmem:[#allocation5 + $0x3c0] sm:$0xff]  ;;  %v225_v5 = vld [vmem:[#allocation5 + $0x3f8] sm:$0xff] }
  0x1c   :  { %v156_v13 = vld [vmem:[#allocation5 + $0x1d0] sm:$0xff]  ;;  %v154_v15 = vld [vmem:[#allocation5 + $0x1c0] sm:$0xff]  ;;  %321 = vmatpush.msra.mxu3 %v220_v10  ;;  %293 = vmatpush.msra.mxu2 %v186_v11  ;;  %v127_v7 = vld [vmem:[#allocation5 + $0xe8] sm:$0xff] }
  0x1d   :  { %263 = vmatpush.msra.mxu1 %v156_v13  ;;  %v184_v16 = vld [vmem:[#allocation5 + $0x2b0] sm:$0xff]  ;;  %235 = vmatpush.msra.mxu0 %v122_v12  ;;  %v182_v20 = vld [vmem:[#allocation5 + $0x2a0] sm:$0xff]  ;;  %v844_v8 = vld [vmem:[#allocation2 + $0x8] sm:$0xff] }
  0x1e   :  { %v120_v17 = vld [vmem:[#allocation5 + $0xb0] sm:$0xff]  ;;  %322 = vmatpush.msra.mxu3 %v218_v14  ;;  %v118_v21 = vld [vmem:[#allocation5 + $0xa0] sm:$0xff]  ;;  %294 = vmatpush.msra.mxu2 %v184_v16  ;;  %v189_v9 = vld [vmem:[#allocation5 + $0x2d8] sm:$0xff] }
  0x1f   :  { %v216_v18 = vld [vmem:[#allocation5 + $0x3b0] sm:$0xff]  ;;  %264 = vmatpush.msra.mxu1 %v154_v15  ;;  %236 = vmatpush.msra.mxu0 %v120_v17  ;;  %v214_v22 = vld [vmem:[#allocation5 + $0x3a0] sm:$0xff]  ;;  %v161_v10 = vld [vmem:[#allocation5 + $0x1f8] sm:$0xff] }
  0x20   :  { %v152_v19 = vld [vmem:[#allocation5 + $0x1b0] sm:$0xff]  ;;  %v150_v23 = vld [vmem:[#allocation5 + $0x1a0] sm:$0xff]  ;;  %323 = vmatpush.msra.mxu3 %v216_v18  ;;  %295 = vmatpush.msra.mxu2 %v182_v20  ;;  %v223_v11 = vld [vmem:[#allocation5 + $0x3e8] sm:$0xff] }
  0x21   :  { %265 = vmatpush.msra.mxu1 %v152_v19  ;;  %v180_v24 = vld [vmem:[#allocation5 + $0x290] sm:$0xff]  ;;  %237 = vmatpush.msra.mxu0 %v118_v21  ;;  %v178_v28 = vld [vmem:[#allocation5 + $0x280] sm:$0xff]  ;;  %v125_v12 = vld [vmem:[#allocation5 + $0xd8] sm:$0xff] }
  0x22   :  { %v116_v25 = vld [vmem:[#allocation5 + $0x90] sm:$0xff]  ;;  %324 = vmatpush.msra.mxu3 %v214_v22  ;;  %v114_v29 = vld [vmem:[#allocation5 + $0x80] sm:$0xff]  ;;  %296 = vmatpush.msra.mxu2 %v180_v24  ;;  %v187_v13 = vld [vmem:[#allocation5 + $0x2c8] sm:$0xff] }
  0x23   :  { %v212_v26 = vld [vmem:[#allocation5 + $0x390] sm:$0xff]  ;;  %266 = vmatpush.msra.mxu1 %v150_v23  ;;  %238 = vmatpush.msra.mxu0 %v116_v25  ;;  %v210_v30 = vld [vmem:[#allocation5 + $0x380] sm:$0xff]  ;;  %v159_v14 = vld [vmem:[#allocation5 + $0x1e8] sm:$0xff] }
  0x24   :  { %v148_v27 = vld [vmem:[#allocation5 + $0x190] sm:$0xff]  ;;  %v146_v31 = vld [vmem:[#allocation5 + $0x180] sm:$0xff]  ;;  %325 = vmatpush.msra.mxu3 %v212_v26  ;;  %297 = vmatpush.msra.mxu2 %v178_v28  ;;  %v221_v15 = vld [vmem:[#allocation5 + $0x3d8] sm:$0xff] }
  0x25   :  { %267 = vmatpush.msra.mxu1 %v148_v27  ;;  %v176_v32 = vld [vmem:[#allocation5 + $0x270] sm:$0xff]  ;;  %239 = vmatpush.msra.mxu0 %v114_v29  ;;  %v174_v36 = vld [vmem:[#allocation5 + $0x260] sm:$0xff]  ;;  %v123_v17 = vld [vmem:[#allocation5 + $0xc8] sm:$0xff] }
  0x26   :  { %v112_v33 = vld [vmem:[#allocation5 + $0x70] sm:$0xff]  ;;  %326 = vmatpush.msra.mxu3 %v210_v30  ;;  %v110_v37 = vld [vmem:[#allocation5 + $0x60] sm:$0xff]  ;;  %298 = vmatpush.msra.mxu2 %v176_v32  ;;  %v157_v18 = vld [vmem:[#allocation5 + $0x1d8] sm:$0xff] }
  0x27   :  { %v208_v34 = vld [vmem:[#allocation5 + $0x370] sm:$0xff]  ;;  %268 = vmatpush.msra.mxu1 %v146_v31  ;;  %240 = vmatpush.msra.mxu0 %v112_v33  ;;  %v206_v38 = vld [vmem:[#allocation5 + $0x360] sm:$0xff]  ;;  %v185_v19 = vld [vmem:[#allocation5 + $0x2b8] sm:$0xff] }
  0x28   :  { %v144_v35 = vld [vmem:[#allocation5 + $0x170] sm:$0xff]  ;;  %v142_v39 = vld [vmem:[#allocation5 + $0x160] sm:$0xff]  ;;  %327 = vmatpush.msra.mxu3 %v208_v34  ;;  %299 = vmatpush.msra.mxu2 %v174_v36  ;;  %v219_v20 = vld [vmem:[#allocation5 + $0x3c8] sm:$0xff] }
  0x29   :  { %269 = vmatpush.msra.mxu1 %v144_v35  ;;  %v172_v40 = vld [vmem:[#allocation5 + $0x250] sm:$0xff]  ;;  %241 = vmatpush.msra.mxu0 %v110_v37  ;;  %v170_v44 = vld [vmem:[#allocation5 + $0x240] sm:$0xff]  ;;  %v852_v22 = vld [vmem:[#allocation2 + $0x38] sm:$0xff] }
  0x2a   :  { %v108_v41 = vld [vmem:[#allocation5 + $0x50] sm:$0xff]  ;;  %328 = vmatpush.msra.mxu3 %v206_v38  ;;  %v106_v45 = vld [vmem:[#allocation5 + $0x40] sm:$0xff]  ;;  %300 = vmatpush.msra.mxu2 %v172_v40  ;;  %v121_v23 = vld [vmem:[#allocation5 + $0xb8] sm:$0xff] }
  0x2b   :  { %v204_v42 = vld [vmem:[#allocation5 + $0x350] sm:$0xff]  ;;  %270 = vmatpush.msra.mxu1 %v142_v39  ;;  %242 = vmatpush.msra.mxu0 %v108_v41  ;;  %v202_v46 = vld [vmem:[#allocation5 + $0x340] sm:$0xff]  ;;  %v155_v24 = vld [vmem:[#allocation5 + $0x1c8] sm:$0xff] }
  0x2c   :  { %v140_v43 = vld [vmem:[#allocation5 + $0x150] sm:$0xff]  ;;  %v138_v47 = vld [vmem:[#allocation5 + $0x140] sm:$0xff]  ;;  %329 = vmatpush.msra.mxu3 %v204_v42  ;;  %301 = vmatpush.msra.mxu2 %v170_v44  ;;  %v183_v25 = vld [vmem:[#allocation5 + $0x2a8] sm:$0xff] }
  0x2d   :  { %271 = vmatpush.msra.mxu1 %v140_v43  ;;  %v168_v48 = vld [vmem:[#allocation5 + $0x230] sm:$0xff]  ;;  %243 = vmatpush.msra.mxu0 %v106_v45  ;;  %v166_v52 = vld [vmem:[#allocation5 + $0x220] sm:$0xff]  ;;  %v217_v26 = vld [vmem:[#allocation5 + $0x3b8] sm:$0xff] }
  0x2e   :  { %v104_v49 = vld [vmem:[#allocation5 + $0x30] sm:$0xff]  ;;  %330 = vmatpush.msra.mxu3 %v202_v46  ;;  %v102_v53 = vld [vmem:[#allocation5 + $0x20] sm:$0xff]  ;;  %302 = vmatpush.msra.mxu2 %v168_v48  ;;  %v855_v27 = vld [vmem:[#allocation2 + $0x28] sm:$0xff] }
  0x2f   :  { %v200_v50 = vld [vmem:[#allocation5 + $0x330] sm:$0xff]  ;;  %272 = vmatpush.msra.mxu1 %v138_v47  ;;  %244 = vmatpush.msra.mxu0 %v104_v49  ;;  %v198_v54 = vld [vmem:[#allocation5 + $0x320] sm:$0xff]  ;;  %v119_v28 = vld [vmem:[#allocation5 + $0xa8] sm:$0xff] }
  0x30   :  { %v136_v51 = vld [vmem:[#allocation5 + $0x130] sm:$0xff]  ;;  %v134_v55 = vld [vmem:[#allocation5 + $0x120] sm:$0xff]  ;;  %331 = vmatpush.msra.mxu3 %v200_v50  ;;  %303 = vmatpush.msra.mxu2 %v166_v52  ;;  %v153_v29 = vld [vmem:[#allocation5 + $0x1b8] sm:$0xff] }
  0x31   :  { %273 = vmatpush.msra.mxu1 %v136_v51  ;;  %v164_v56 = vld [vmem:[#allocation5 + $0x210] sm:$0xff]  ;;  %245 = vmatpush.msra.mxu0 %v102_v53  ;;  %v162_v60 = vld [vmem:[#allocation5 + $0x200] sm:$0xff]  ;;  %v181_v30 = vld [vmem:[#allocation5 + $0x298] sm:$0xff] }
  0x32   :  { %v100_v57 = vld [vmem:[#allocation5 + $0x10] sm:$0xff]  ;;  %332 = vmatpush.msra.mxu3 %v198_v54  ;;  %v98_v61 = vld [vmem:[#allocation5] sm:$0xff]  ;;  %304 = vmatpush.msra.mxu2 %v164_v56  ;;  %v215_v31 = vld [vmem:[#allocation5 + $0x3a8] sm:$0xff] }
  0x33   :  { %v196_v58 = vld [vmem:[#allocation5 + $0x310] sm:$0xff]  ;;  %274 = vmatpush.msra.mxu1 %v134_v55  ;;  %246 = vmatpush.msra.mxu0 %v100_v57  ;;  %v194_v63 = vld [vmem:[#allocation5 + $0x300] sm:$0xff]  ;;  %v117_v32 = vld [vmem:[#allocation5 + $0x98] sm:$0xff] }
  0x34   :  { %v132_v59 = vld [vmem:[#allocation5 + $0x110] sm:$0xff]  ;;  %333 = vmatpush.msra.mxu3 %v196_v58  ;;  %v837_v1 = vld [vmem:[#allocation2] sm:$0xff]  ;;  %305 = vmatpush.msra.mxu2 %v162_v60  ;;  %v151_v33 = vld [vmem:[#allocation5 + $0x1a8] sm:$0xff] }
  0x35   :  { %v835_v62 = vld [vmem:[#allocation2 + $0x10] sm:$0xff]  ;;  %275 = vmatpush.msra.mxu1 %v132_v59  ;;  %247 = vmatpush.msra.mxu0 %v98_v61  ;;  %v130_v6 = vld [vmem:[#allocation5 + $0x100] sm:$0xff]  ;;  %v179_v34 = vld [vmem:[#allocation5 + $0x288] sm:$0xff] }
  0x36   :  { %306 = vmatmul.f32.vlgmr.msra.gmra.mxu2 %v835_v62  ;;  %334 = vmatpush.msra.mxu3 %v194_v63  ;;  %v847_v16 = vld [vmem:[#allocation2 + $0x30] sm:$0xff]  ;;  %v849_v21 = vld [vmem:[#allocation2 + $0x20] sm:$0xff]  ;;  %v213_v35 = vld [vmem:[#allocation5 + $0x398] sm:$0xff] }
  0x37   :  { %406 = vmatpush.msrb.mxu2 %v193_v0  ;;  %248 = vmatmul.f32.vlgmr.msra.gmra.mxu0 %v837_v1  ;;  %v859_v36 = vld [vmem:[#allocation2 + $0x50] sm:$0xff]  ;;  %v115_v37 = vld [vmem:[#allocation5 + $0x88] sm:$0xff]  ;;  %v149_v38 = vld [vmem:[#allocation5 + $0x198] sm:$0xff] }
  0x38   :  { %335 = vmatmul.f32.vlgmr.msra.gmra.mxu3 %v839_v2  ;;  %348 = vmatpush.msrb.mxu0 %v129_v3  ;;  %v177_v39 = vld [vmem:[#allocation5 + $0x278] sm:$0xff]  ;;  %v211_v40 = vld [vmem:[#allocation5 + $0x388] sm:$0xff]  ;;  %v861_v41 = vld [vmem:[#allocation2 + $0x40] sm:$0xff] }
  0x39   :  { %407 = vmatpush.msrb.mxu2 %v191_v4  ;;  %435 = vmatpush.msrb.mxu3 %v225_v5  ;;  %v864_v42 = vld [vmem:[#allocation2 + $0x58] sm:$0xff]  ;;  %v147_v44 = vld [vmem:[#allocation5 + $0x188] sm:$0xff]  ;;  %v871_v56 = vld [vmem:[#allocation2 + $0x70] sm:$0xff] }
  0x3a   :  { %276 = vmatpush.msra.mxu1 %v130_v6  ;;  %349 = vmatpush.msrb.mxu0 %v127_v7  ;;  %v113_v43 = vld [vmem:[#allocation5 + $0x78] sm:$0xff]  ;;  %v175_v45 = vld [vmem:[#allocation5 + $0x268] sm:$0xff]  ;;  %v873_v61 = vld [vmem:[#allocation2 + $0x60] sm:$0xff] }
  0x3b   :  { %277 = vmatmul.f32.vlgmr.msra.gmra.mxu1 %v844_v8  ;;  %408 = vmatpush.msrb.mxu2 %v189_v9  ;;  %v209_v46 = vld [vmem:[#allocation5 + $0x378] sm:$0xff]  ;;  %v867_v47 = vld [vmem:[#allocation2 + $0x48] sm:$0xff] }
  0x3c   :  { %377 = vmatpush.msrb.mxu1 %v161_v10  ;;  %436 = vmatpush.msrb.mxu3 %v223_v11  ;;  %v111_v48 = vld [vmem:[#allocation5 + $0x68] sm:$0xff]  ;;  %v145_v49 = vld [vmem:[#allocation5 + $0x178] sm:$0xff] }
  0x3d   :  { %350 = vmatpush.msrb.mxu0 %v125_v12  ;;  %409 = vmatpush.msrb.mxu2 %v187_v13  ;;  %v173_v50 = vld [vmem:[#allocation5 + $0x258] sm:$0xff]  ;;  %v207_v51 = vld [vmem:[#allocation5 + $0x368] sm:$0xff] }
  0x3e   :  { %378 = vmatpush.msrb.mxu1 %v159_v14  ;;  %437 = vmatpush.msrb.mxu3 %v221_v15  ;;  %v109_v52 = vld [vmem:[#allocation5 + $0x58] sm:$0xff]  ;;  %v143_v53 = vld [vmem:[#allocation5 + $0x168] sm:$0xff] }
  0x3f   :  { %309 = vmatmul.f32.gmra.mxu2 %v847_v16  ;;  %351 = vmatpush.msrb.mxu0 %v123_v17  ;;  %v171_v54 = vld [vmem:[#allocation5 + $0x248] sm:$0xff]  ;;  %v205_v55 = vld [vmem:[#allocation5 + $0x358] sm:$0xff] }
  0x40   :  { %379 = vmatpush.msrb.mxu1 %v157_v18  ;;  %410 = vmatpush.msrb.mxu2 %v185_v19  ;;  %v107_v57 = vld [vmem:[#allocation5 + $0x48] sm:$0xff]  ;;  %v141_v58 = vld [vmem:[#allocation5 + $0x158] sm:$0xff] }
  0x41   :  { %438 = vmatpush.msrb.mxu3 %v219_v20  ;;  %251 = vmatmul.f32.gmra.mxu0 %v849_v21  ;;  %v169_v59 = vld [vmem:[#allocation5 + $0x238] sm:$0xff]  ;;  %v203_v60 = vld [vmem:[#allocation5 + $0x348] sm:$0xff] }
  0x42   :  { %338 = vmatmul.f32.gmra.mxu3 %v852_v22  ;;  %352 = vmatpush.msrb.mxu0 %v121_v23  ;;  %v876_v63 = vld [vmem:[#allocation2 + $0x78] sm:$0xff]  ;;  %v139_v3 = vld [vmem:[#allocation5 + $0x148] sm:$0xff] }
  0x43   :  { %380 = vmatpush.msrb.mxu1 %v155_v24  ;;  %411 = vmatpush.msrb.mxu2 %v183_v25  ;;  %v105_v0 = vld [vmem:[#allocation5 + $0x38] sm:$0xff]  ;;  %v167_v4 = vld [vmem:[#allocation5 + $0x228] sm:$0xff] }
  0x44   :  { %439 = vmatpush.msrb.mxu3 %v217_v26  ;;  %280 = vmatmul.f32.gmra.mxu1 %v855_v27  ;;  %v201_v5 = vld [vmem:[#allocation5 + $0x338] sm:$0xff]  ;;  %v879_v6 = vld [vmem:[#allocation2 + $0x68] sm:$0xff] }
  0x45   :  { %353 = vmatpush.msrb.mxu0 %v119_v28  ;;  %381 = vmatpush.msrb.mxu1 %v153_v29  ;;  %v103_v7 = vld [vmem:[#allocation5 + $0x28] sm:$0xff]  ;;  %v137_v9 = vld [vmem:[#allocation5 + $0x138] sm:$0xff] }
  0x46   :  { %412 = vmatpush.msrb.mxu2 %v181_v30  ;;  %440 = vmatpush.msrb.mxu3 %v215_v31  ;;  %v165_v10 = vld [vmem:[#allocation5 + $0x218] sm:$0xff]  ;;  %v199_v11 = vld [vmem:[#allocation5 + $0x328] sm:$0xff] }
  0x47   :  { %354 = vmatpush.msrb.mxu0 %v117_v32  ;;  %382 = vmatpush.msrb.mxu1 %v151_v33  ;;  %v101_v12 = vld [vmem:[#allocation5 + $0x18] sm:$0xff]  ;;  %v135_v13 = vld [vmem:[#allocation5 + $0x128] sm:$0xff] }
  0x48   :  { %413 = vmatpush.msrb.mxu2 %v179_v34  ;;  %441 = vmatpush.msrb.mxu3 %v213_v35  ;;  %v163_v14 = vld [vmem:[#allocation5 + $0x208] sm:$0xff]  ;;  %v197_v15 = vld [vmem:[#allocation5 + $0x318] sm:$0xff]  ;;  %v899_v34 = vld [vmem:[#allocation7] sm:$0x3] }
  0x49   :  { %312 = vmatmul.f32.gmra.mxu2 %v859_v36  ;;  %355 = vmatpush.msrb.mxu0 %v115_v37  ;;  %v99_v17 = vld [vmem:[#allocation5 + $0x8] sm:$0xff]  ;;  %v133_v18 = vld [vmem:[#allocation5 + $0x118] sm:$0xff] }
  0x4a   :  { %383 = vmatpush.msrb.mxu1 %v149_v38  ;;  %414 = vmatpush.msrb.mxu2 %v177_v39  ;;  %v195_v19 = vld [vmem:[#allocation5 + $0x308] sm:$0xff]  ;;  %v487_v23 = vld [vmem:[#allocation8 + $0x78] sm:$0xff]  ;;  %v486_v24 = vld [vmem:[#allocation8 + $0x70] sm:$0xff] }
  0x4b   :  { %442 = vmatpush.msrb.mxu3 %v211_v40  ;;  %254 = vmatmul.f32.gmra.mxu0 %v861_v41  ;;  %v131_v20 = vld [vmem:[#allocation5 + $0x108] sm:$0xff]  ;;  %v475_v28 = vld [vmem:[#allocation8 + $0x18] sm:$0xff]  ;;  %v474_v29 = vld [vmem:[#allocation8 + $0x10] sm:$0xff] }
  0x4c   :  { %341 = vmatmul.f32.gmra.mxu3 %v864_v42  ;;  %356 = vmatpush.msrb.mxu0 %v113_v43  ;;  %v485_v25 = vld [vmem:[#allocation8 + $0x68] sm:$0xff]  ;;  %v472_v31 = vld [vmem:[#allocation8] sm:$0xff]  ;;  %v503_v32 = vld [vmem:[#allocation8 + $0xf8] sm:$0xff] }
  0x4d   :  { %384 = vmatpush.msrb.mxu1 %v147_v44  ;;  %415 = vmatpush.msrb.mxu2 %v175_v45  ;;  %v477_v26 = vld [vmem:[#allocation8 + $0x28] sm:$0xff]  ;;  %v502_v33 = vld [vmem:[#allocation8 + $0xf0] sm:$0xff]  ;;  %v500_v37 = vld [vmem:[#allocation8 + $0xe0] sm:$0xff] }
  0x4e   :  { %443 = vmatpush.msrb.mxu3 %v209_v46  ;;  %283 = vmatmul.f32.gmra.mxu1 %v867_v47  ;;  %v473_v30 = vld [vmem:[#allocation8 + $0x8] sm:$0xff]  ;;  %v499_v38 = vld [vmem:[#allocation8 + $0xd8] sm:$0xff] }
  0x4f   :  { %357 = vmatpush.msrb.mxu0 %v111_v48  ;;  %385 = vmatpush.msrb.mxu1 %v145_v49  ;;  %v501_v35 = vld [vmem:[#allocation8 + $0xe8] sm:$0xff]  ;;  %v496_v48 = vld [vmem:[#allocation8 + $0xc0] sm:$0xff] }
  0x50   :  { %416 = vmatpush.msrb.mxu2 %v173_v50  ;;  %444 = vmatpush.msrb.mxu3 %v207_v51  ;;  %v497_v43 = vld [vmem:[#allocation8 + $0xc8] sm:$0xff]  ;;  %v495_v50 = vld [vmem:[#allocation8 + $0xb8] sm:$0xff] }
  0x51   :  { %358 = vmatpush.msrb.mxu0 %v109_v52  ;;  %386 = vmatpush.msrb.mxu1 %v143_v53  ;;  %v494_v53 = vld [vmem:[#allocation8 + $0xb0] sm:$0xff] }
  0x52   :  { %417 = vmatpush.msrb.mxu2 %v171_v54  ;;  %445 = vmatpush.msrb.mxu3 %v205_v55  ;;  %v493_v55 = vld [vmem:[#allocation8 + $0xa8] sm:$0xff] }
  0x53   :  { %315 = vmatmul.f32.gmra.mxu2 %v871_v56  ;;  %359 = vmatpush.msrb.mxu0 %v107_v57 }
  0x54   :  { %387 = vmatpush.msrb.mxu1 %v141_v58  ;;  %418 = vmatpush.msrb.mxu2 %v169_v59  ;;  %v492_v58 = vld [vmem:[#allocation8 + $0xa0] sm:$0xff] }
  0x55   :  { %446 = vmatpush.msrb.mxu3 %v203_v60  ;;  %257 = vmatmul.f32.gmra.mxu0 %v873_v61 }
  0x56   :  { %344 = vmatmul.f32.gmra.mxu3 %v876_v63  ;;  %360 = vmatpush.msrb.mxu0 %v105_v0 }
  0x57   :  { %388 = vmatpush.msrb.mxu1 %v139_v3  ;;  %419 = vmatpush.msrb.mxu2 %v167_v4  ;;  %v490_v3 = vld [vmem:[#allocation8 + $0x90] sm:$0xff] }
  0x58   :  { %447 = vmatpush.msrb.mxu3 %v201_v5  ;;  %286 = vmatmul.f32.gmra.mxu1 %v879_v6 }
  0x59   :  { %361 = vmatpush.msrb.mxu0 %v103_v7  ;;  %389 = vmatpush.msrb.mxu1 %v137_v9  ;;  %v488_v9 = vld [vmem:[#allocation8 + $0x80] sm:$0xff] }
  0x5a   :  { %420 = vmatpush.msrb.mxu2 %v165_v10  ;;  %448 = vmatpush.msrb.mxu3 %v199_v11 }
  0x5b   :  { %362 = vmatpush.msrb.mxu0 %v101_v12  ;;  %390 = vmatpush.msrb.mxu1 %v135_v13 }
  0x5c   :  { %421 = vmatpush.msrb.mxu2 %v163_v14  ;;  %449 = vmatpush.msrb.mxu3 %v197_v15 }
  0x5d   :  { %363 = vmatpush.msrb.mxu0 %v99_v17  ;;  %391 = vmatpush.msrb.mxu1 %v133_v18 }
  0x5e   :  { %422 = vmatmul.f32.vlgmr.msrb.gmra.mxu2 %v835_v62  ;;  %450 = vmatpush.msrb.mxu3 %v195_v19  ;;  %v484_v62 = vld [vmem:[#allocation8 + $0x60] sm:$0xff] }
  0x5f   :  { %364 = vmatmul.f32.vlgmr.msrb.gmra.mxu0 %v837_v1  ;;  %392 = vmatpush.msrb.mxu1 %v131_v20  ;;  %v483_v1 = vld [vmem:[#allocation8 + $0x58] sm:$0xff] }
  0x60   :  { %451 = vmatmul.f32.vlgmr.msrb.gmra.mxu3 %v839_v2  ;;  %393 = vmatmul.f32.vlgmr.msrb.gmra.mxu1 %v844_v8  ;;  %v482_v2 = vld [vmem:[#allocation8 + $0x50] sm:$0xff]  ;;  %v481_v8 = vld [vmem:[#allocation8 + $0x48] sm:$0xff] }
  0x61   :  { %508 = vmatpush.msra.mxu0 %v487_v23  ;;  %591 = vmatpush.msra.mxu2 %v487_v23 }
  0x62   :  { %537 = vmatpush.msra.mxu1 %v503_v32  ;;  %607 = vmatpush.msra.mxu3 %v503_v32 }
  0x63   :  { %509 = vmatpush.msra.mxu0 %v486_v24  ;;  %592 = vmatpush.msra.mxu2 %v486_v24 }
  0x64   :  { %538 = vmatpush.msra.mxu1 %v502_v33  ;;  %608 = vmatpush.msra.mxu3 %v502_v33 }
  0x65   :  { %510 = vmatpush.msra.mxu0 %v485_v25  ;;  %593 = vmatpush.msra.mxu2 %v485_v25 }
  0x66   :  { %425 = vmatmul.f32.gmra.mxu2 %v847_v16  ;;  %v480_v16 = vld [vmem:[#allocation8 + $0x40] sm:$0xff]  ;;  %539 = vmatpush.msra.mxu1 %v501_v35 }
  0x67   :  { %367 = vmatmul.f32.gmra.mxu0 %v849_v21  ;;  %594 = vmatpush.msra.mxu2 %v484_v62  ;;  %v479_v21 = vld [vmem:[#allocation8 + $0x38] sm:$0xff] }
  0x68   :  { %454 = vmatmul.f32.gmra.mxu3 %v852_v22  ;;  %396 = vmatmul.f32.gmra.mxu1 %v855_v27  ;;  %v478_v22 = vld [vmem:[#allocation8 + $0x30] sm:$0xff]  ;;  %v476_v27 = vld [vmem:[#allocation8 + $0x20] sm:$0xff] }
  0x69   :  { %511 = vmatpush.msra.mxu0 %v484_v62  ;;  %595 = vmatpush.msra.mxu2 %v483_v1 }
  0x6a   :  { %609 = vmatpush.msra.mxu3 %v501_v35  ;;  %540 = vmatpush.msra.mxu1 %v500_v37 }
  0x6b   :  { %512 = vmatpush.msra.mxu0 %v483_v1  ;;  %596 = vmatpush.msra.mxu2 %v482_v2  ;;  %v229_v1 = vperm.slane %v899_v34, 1 }
  0x6c   :  { %610 = vmatpush.msra.mxu3 %v500_v37  ;;  %541 = vmatpush.msra.mxu1 %v499_v38 }
  0x6d   :  { %513 = vmatpush.msra.mxu0 %v482_v2  ;;  %597 = vmatpush.msra.mxu2 %v481_v8 }
  0x6e   :  { %428 = vmatmul.f32.gmra.mxu2 %v859_v36  ;;  %v902_v36 = vperm.slane %v899_v34, 0  ;;  %611 = vmatpush.msra.mxu3 %v499_v38 }
  0x6f   :  { %370 = vmatmul.f32.gmra.mxu0 %v861_v41  ;;  %598 = vmatpush.msra.mxu2 %v480_v16  ;;  %v498_v41 = vld [vmem:[#allocation8 + $0xd0] sm:$0xff] }
  0x70   :  { %457 = vmatmul.f32.gmra.mxu3 %v864_v42  ;;  %399 = vmatmul.f32.gmra.mxu1 %v867_v47 }
  0x71   :  { %514 = vmatpush.msra.mxu0 %v481_v8  ;;  %599 = vmatpush.msra.mxu2 %v479_v21 }
  0x72   :  { %542 = vmatpush.msra.mxu1 %v498_v41  ;;  %612 = vmatpush.msra.mxu3 %v498_v41 }
  0x73   :  { %515 = vmatpush.msra.mxu0 %v480_v16  ;;  %600 = vmatpush.msra.mxu2 %v478_v22 }
  0x74   :  { %543 = vmatpush.msra.mxu1 %v497_v43  ;;  %613 = vmatpush.msra.mxu3 %v497_v43 }
  0x75   :  { %516 = vmatpush.msra.mxu0 %v479_v21  ;;  %601 = vmatpush.msra.mxu2 %v477_v26 }
  0x76   :  { %431 = vmatmul.f32.gmra.mxu2 %v871_v56  ;;  %544 = vmatpush.msra.mxu1 %v496_v48 }
  0x77   :  { %373 = vmatmul.f32.gmra.mxu0 %v873_v61  ;;  %602 = vmatpush.msra.mxu2 %v476_v27 }
  0x78   :  { %460 = vmatmul.f32.gmra.mxu3 %v876_v63  ;;  %402 = vmatmul.f32.gmra.mxu1 %v879_v6  ;;  %v491_v63 = vld [vmem:[#allocation8 + $0x98] sm:$0xff]  ;;  %v489_v6 = vld [vmem:[#allocation8 + $0x88] sm:$0xff] }
  0x79   :  { %517 = vmatpush.msra.mxu0 %v478_v22  ;;  %603 = vmatpush.msra.mxu2 %v475_v28 }
  0x7a   :  { %614 = vmatpush.msra.mxu3 %v496_v48  ;;  %545 = vmatpush.msra.mxu1 %v495_v50 }
  0x7b   :  { %518 = vmatpush.msra.mxu0 %v477_v26  ;;  %604 = vmatpush.msra.mxu2 %v474_v29 }
  0x7c   :  { %615 = vmatpush.msra.mxu3 %v495_v50  ;;  %546 = vmatpush.msra.mxu1 %v494_v53 }
  0x7d   :  { %519 = vmatpush.msra.mxu0 %v476_v27  ;;  %605 = vmatpush.msra.mxu2 %v473_v30 }
  0x7e   :  { %616 = vmatpush.msra.mxu3 %v494_v53  ;;  %547 = vmatpush.msra.mxu1 %v493_v55 }
  0x7f   :  { %520 = vmatpush.msra.mxu0 %v475_v28  ;;  %606 = vmatpush.msra.mxu2 %v472_v31 }
  0x80   :  { %617 = vmatpush.msra.mxu3 %v493_v55  ;;  %548 = vmatpush.msra.mxu1 %v492_v58 }
  0x81   :  { %521 = vmatpush.msra.mxu0 %v474_v29 }
  0x82   :  { %618 = vmatpush.msra.mxu3 %v492_v58  ;;  %549 = vmatpush.msra.mxu1 %v491_v63 }
  0x83   :  { %522 = vmatpush.msra.mxu0 %v473_v30 }
  0x84   :  { %619 = vmatpush.msra.mxu3 %v491_v63  ;;  %550 = vmatpush.msra.mxu1 %v490_v3 }
  0x85   :  { %523 = vmatpush.msra.mxu0 %v472_v31 }
  0x86   :  { %620 = vmatpush.msra.mxu3 %v490_v3  ;;  %551 = vmatpush.msra.mxu1 %v489_v6 }
  0x88   :  { %621 = vmatpush.msra.mxu3 %v489_v6  ;;  %552 = vmatpush.msra.mxu1 %v488_v9 }
  0x8a   :  { %622 = vmatpush.msra.mxu3 %v488_v9 }
  0xb4   :  { %v249_v39 = vpop.f32.mrf.mxu0 }
  0xb5   :  { %v250_v40 = vadd.f32 %v249_v39, %v902_v36 }
  0xb8   :  { %v278_v42 = vpop.f32.mrf.mxu1 }
  0xb9   :  { %v279_v44 = vadd.f32 %v278_v42, %v250_v40  ;;  %v307_v45 = vpop.f32.mrf.mxu2 }
  0xbb   :  { %v308_v46 = vadd.f32 %v307_v45, %v279_v44  ;;  %v336_v47 = vpop.f32.mrf.mxu3 }
  0xbd   :  { %v337_v49 = vadd.f32 %v336_v47, %v308_v46 }
  0xbe   :  { %v252_v51 = vpop.f32.mrf.mxu0 }
  0xbf   :  { %635 = vtanh.f32 %v337_v49  ;;  %v253_v52 = vadd.f32 %v252_v51, %v902_v36 }
  0xc1   :  { %v281_v54 = vpop.f32.mrf.mxu1 }
  0xc2   :  { %v282_v56 = vadd.f32 %v281_v54, %v253_v52  ;;  %v310_v57 = vpop.f32.mrf.mxu2 }
  0xc4   :  { %v311_v59 = vadd.f32 %v310_v57, %v282_v56 }
  0xc5   :  { %v636_v60 = vpop.eup %635  ;;  %v339_v61 = vpop.f32.mrf.mxu3 }
  0xc6   :  { %v340_v0 = vadd.f32 %v339_v61, %v311_v59  ;;  %524 = vmatmul.f32.vlgmr.msra.gmra.mxu0 %v636_v60  ;;  %v634_v60 = vld [vmem:[%s922_s4] ss:$0 sm:$0xff]  ;;  %s576_s4 = sshll.u32 %s923_s5, 4  ;;  %s577_s4 = int_to_ptr.hbm [resolvable:$true] %s576_s4 }
  0xc8   :  { %637 = vtanh.f32 %v340_v0  ;;  %v255_v4 = vpop.f32.mrf.mxu0 }
  0xc9   :  { %v256_v5 = vadd.f32 %v255_v4, %v902_v36 }
  0xcb   :  { %v284_v7 = vpop.f32.mrf.mxu1 }
  0xcc   :  { %v285_v10 = vadd.f32 %v284_v7, %v256_v5  ;;  %v313_v11 = vpop.f32.mrf.mxu2 }
  0xce   :  { %v638_v12 = vpop.eup %637  ;;  %v314_v13 = vadd.f32 %v313_v11, %v285_v10 }
  0xcf   :  { %v342_v14 = vpop.f32.mrf.mxu3  ;;  %527 = vmatmul.f32.gmra.mxu0 %v638_v12 }
  0xd0   :  { %v343_v15 = vadd.f32 %v342_v14, %v314_v13 }
  0xd2   :  { %639 = vtanh.f32 %v343_v15  ;;  %v258_v17 = vpop.f32.mrf.mxu0 }
  0xd3   :  { %v259_v18 = vadd.f32 %v258_v17, %v902_v36 }
  0xd5   :  { %v287_v19 = vpop.f32.mrf.mxu1 }
  0xd6   :  { %v288_v20 = vadd.f32 %v287_v19, %v259_v18  ;;  %v316_v23 = vpop.f32.mrf.mxu2 }
  0xd8   :  { %v640_v24 = vpop.eup %639  ;;  %v317_v25 = vadd.f32 %v316_v23, %v288_v20 }
  0xd9   :  { %v345_v62 = vpop.f32.mrf.mxu3  ;;  %530 = vmatmul.f32.vlgmr.msra.gmra.mxu2 %v640_v24 }
  0xda   :  { %v346_v2 = vadd.f32 %v345_v62, %v317_v25 }
  0xdc   :  { %641 = vtanh.f32 %v346_v2  ;;  %v365_v8 = vpop.f32.mrf.mxu0 }
  0xdd   :  { %v366_v16 = vadd.f32 %v365_v8, %v229_v1  ;;  %v394_v21 = vpop.f32.mrf.mxu1 }
  0xdf   :  { %v395_v22 = vadd.f32 %v394_v21, %v366_v16 }
  0xe1   :  { %v423_v26 = vpop.f32.mrf.mxu2 }
  0xe2   :  { %v642_v27 = vpop.eup %641  ;;  %v424_v28 = vadd.f32 %v423_v26, %v395_v22 }
  0xe3   :  { %v452_v29 = vpop.f32.mrf.mxu3  ;;  %533 = vmatmul.f32.gmra.mxu2 %v642_v27 }
  0xe4   :  { %v453_v30 = vadd.f32 %v452_v29, %v424_v28  ;;  %v368_v31 = vpop.f32.mrf.mxu0 }
  0xe5   :  { %v369_v32 = vadd.f32 %v368_v31, %v229_v1  ;;  %v397_v33 = vpop.f32.mrf.mxu1 }
  0xe6   :  { %643 = vtanh.f32 %v453_v30 }
  0xe7   :  { %v398_v35 = vadd.f32 %v397_v33, %v369_v32 }
  0xe9   :  { %v426_v36 = vpop.f32.mrf.mxu2 }
  0xea   :  { %v427_v34 = vadd.f32 %v426_v36, %v398_v35 }
  0xeb   :  { %v455_v37 = vpop.f32.mrf.mxu3 }
  0xec   :  { %v644_v38 = vpop.eup %643  ;;  %v456_v39 = vadd.f32 %v455_v37, %v427_v34  ;;  %v371_v40 = vpop.f32.mrf.mxu0 }
  0xed   :  { %v372_v41 = vadd.f32 %v371_v40, %v229_v1  ;;  %553 = vmatmul.f32.vlgmr.msra.gmra.mxu1 %v644_v38  ;;  %v400_v42 = vpop.f32.mrf.mxu1 }
  0xee   :  { %645 = vtanh.f32 %v456_v39 }
  0xef   :  { %v401_v43 = vadd.f32 %v400_v42, %v372_v41 }
  0xf1   :  { %v429_v44 = vpop.f32.mrf.mxu2 }
  0xf2   :  { %v430_v45 = vadd.f32 %v429_v44, %v401_v43 }
  0xf3   :  { %v458_v46 = vpop.f32.mrf.mxu3 }
  0xf4   :  { %v646_v47 = vpop.eup %645  ;;  %v459_v48 = vadd.f32 %v458_v46, %v430_v45  ;;  %v374_v49 = vpop.f32.mrf.mxu0 }
  0xf5   :  { %v375_v50 = vadd.f32 %v374_v49, %v229_v1  ;;  %556 = vmatmul.f32.gmra.mxu1 %v646_v47  ;;  %v403_v51 = vpop.f32.mrf.mxu1 }
  0xf6   :  { %647 = vtanh.f32 %v459_v48 }
  0xf7   :  { %v404_v52 = vadd.f32 %v403_v51, %v375_v50 }
  0xf9   :  { %v432_v53 = vpop.f32.mrf.mxu2 }
  0xfa   :  { %v433_v54 = vadd.f32 %v432_v53, %v404_v52 }
  0xfb   :  { %v461_v55 = vpop.f32.mrf.mxu3 }
  0xfc   :  { %v648_v56 = vpop.eup %647  ;;  %v462_v57 = vadd.f32 %v461_v55, %v433_v54 }
  0xfd   :  { %559 = vmatmul.f32.vlgmr.msra.gmra.mxu3 %v648_v56 }
  0xfe   :  { %649 = vtanh.f32 %v462_v57 }
 0x104   :  { %v650_v58 = vpop.eup %649 }
 0x105   :  { %562 = vmatmul.f32.gmra.mxu3 %v650_v58 }
 0x143   :  { %v525_v59 = vpop.f32.mrf.mxu0 }
 0x144   :  { %v526_v61 = vadd.f32 %v634_v60, %v525_v59 }
 0x14c   :  { %v528_v3 = vpop.f32.mrf.mxu0 }
 0x14d   :  { %v529_v4 = vadd.f32 %v634_v60, %v528_v3 }
 0x15c   :  { %v531_v7 = vpop.f32.mrf.mxu2 }
 0x15d   :  { %v532_v9 = vadd.f32 %v634_v60, %v531_v7 }
 0x166   :  { %v534_v12 = vpop.f32.mrf.mxu2 }
 0x167   :  { %v535_v13 = vadd.f32 %v634_v60, %v534_v12 }
 0x16a   :  { %v554_v63 = vpop.f32.mrf.mxu1 }
 0x16b   :  { %v555_v0 = vadd.f32 %v554_v63, %v526_v61 }
 0x16d   :  { %566 = vst [vmem:[#allocation10] sm:$0xff] %v555_v0 }
 0x172   :  { %v557_v5 = vpop.f32.mrf.mxu1 }
 0x173   :  { %v558_v6 = vadd.f32 %v557_v5, %v529_v4 }
 0x175   :  { %567 = vst [vmem:[#allocation10 + $0x8] sm:$0xff] %v558_v6 }
 0x180   :  { %v560_v10 = vpop.f32.mrf.mxu3 }
 0x181   :  { %v561_v11 = vadd.f32 %v560_v10, %v532_v9 }
 0x183   :  { %568 = vst [vmem:[#allocation10 + $0x10] sm:$0xff] %v561_v11 }
 0x188   :  { %v563_v14 = vpop.f32.mrf.mxu3 }
 0x189   :  { %v564_v15 = vadd.f32 %v563_v14, %v535_v13 }
 0x18b   :  { %569 = vst [vmem:[#allocation10 + $0x18] sm:$0xff] %v564_v15 }
 0x18c   :  { %582 = dma.vmem_to_hbm [thread:$0]  %s575_s18, 512, %s577_s4, [#allocation4], %s787_s15, %s787_s15, %s788_s16  }
 0x18d   :  { %777 = dma.done.wait [#allocation4], 512  }
 0x18e   :  { %778 = vsyncadd [#allocation4], 4294966784 }
 0x18f   :  { %587 = vsyncpa [#allocation3], 1 }
 0x190   :  { %588 = vsyncpa [#allocation6], 1 }
 0x191   :  { %589 = vsyncpa [#allocation9], 1 }
 0x192   :  { %590 = vsyncpa [#allocation4], 1 }

</bundles_post_ra>
